<compile_context>
chip_gen: v7x
topology: tpu7x:2x2x1
jax: 0.10.0
libtpu: 0.0.40
codegen_flags: <defaults>
</compile_context>

<pallas_src>
import functools

import jax
import jax.numpy as jnp
from jax.experimental import pallas as pl
from jax.experimental.pallas import tpu as pltpu

KH = KW = 3  # kernel_size = 3 -> "same" padding = 1


def _conv_kernel(x_ref, w_ref, b_ref, m_ref, o_ref, acc_ref, *, W):
    # x_ref  : (1, C_in, M)          VMEM, M = H*W flattened NCHW spatial (lane axis)
    # w_ref  : (KH, C_out, KW*C_in)  VMEM, [kh, o, kw*C_in + c] = weight[o, c, kh, kw]
    # b_ref  : (C_out, 1)            VMEM
    # m_ref  : (4, M)                VMEM 0/1 border masks: [w>0, w<W-1, h>0, h<H-1]
    # o_ref  : (1, C_out, M)         VMEM
    # acc_ref: (C_out, M)            VMEM f32 scratch accumulator
    C_out, M = acc_ref.shape

    x2 = x_ref[0]                                    # (C_in, M), lane-dense
    mw_l = m_ref[0:1, :]                             # valid where w-1 >= 0
    mw_r = m_ref[1:2, :]                             # valid where w+1 <= W-1
    mh_u = m_ref[2:3, :]                             # valid where h-1 >= 0
    mh_d = m_ref[3:4, :]                             # valid where h+1 <= H-1

    # kw-folded slab, built once per image:
    #   xs[kw*C_in + c, h*W + w] = x[c, h, w + kw - 1]  (zero outside the row).
    x_l = pltpu.roll(x2, 1, axis=1) * mw_l           # kw = 0 tap (left neighbour)
    x_r = pltpu.roll(x2, M - 1, axis=1) * mw_r       # kw = 2 tap (right neighbour)
    xs = jnp.concatenate([x_l, x2, x_r], axis=0)     # (KW*C_in, M)

    # Accumulator starts from the broadcast bias (lane-dense, one pass).
    acc_ref[...] = jnp.broadcast_to(b_ref[...], (C_out, M)).astype(jnp.float32)

    # kh = 1 (same row): slab already aligned.
    acc_ref[...] += jnp.dot(w_ref[1], xs, preferred_element_type=jnp.float32)
    # kh = 0 (row above): realign with a +W lane roll; output row h=0 gets zero.
    up = pltpu.roll(xs, W, axis=1)
    acc_ref[...] += jnp.dot(w_ref[0], up, preferred_element_type=jnp.float32) * mh_u
    # kh = 2 (row below): realign with a -W lane roll; output row h=H-1 gets zero.
    dn = pltpu.roll(xs, M - W, axis=1)
    acc_ref[...] += jnp.dot(w_ref[2], dn, preferred_element_type=jnp.float32) * mh_d

    o_ref[0] = acc_ref[...].astype(o_ref.dtype)


@jax.jit
def conv_padding_forward(x_nchw, weight_oihw, bias):
    """Matches nn.Conv2d(C_in, C_out, 3, stride=1, padding=1, bias=True) on NCHW input."""
    N, C_in, H, W = x_nchw.shape
    C_out = weight_oihw.shape[0]
    M = H * W

    # Free, contiguous reshapes only — no NHWC transposes.
    xf = x_nchw.reshape(N, C_in, M)
    # [kh, o, kw*C_in + c] = weight[o, c, kh, kw]
    wk = jnp.transpose(weight_oihw, (2, 0, 3, 1)).reshape(KH, C_out, KW * C_in)
    b2 = bias.reshape(C_out, 1).astype(jnp.float32)

    # Shape-only 0/1 border masks over the flattened index p = h*W + w
    # (computed by XLA outside the kernel; effectively compile-time constants).
    p = jnp.arange(M, dtype=jnp.int32)
    wi, hi = p % W, p // W
    masks = jnp.stack([wi > 0, wi < W - 1, hi > 0, hi < H - 1], axis=0)
    masks = masks.astype(jnp.float32)

    out_flat = pl.pallas_call(
        functools.partial(_conv_kernel, W=W),
        out_shape=jax.ShapeDtypeStruct((N, C_out, M), x_nchw.dtype),
        grid_spec=pltpu.PrefetchScalarGridSpec(
            num_scalar_prefetch=0,
            grid=(N,),
            in_specs=[
                pl.BlockSpec((1, C_in, M), lambda n: (n, 0, 0)),
                pl.BlockSpec((KH, C_out, KW * C_in), lambda n: (0, 0, 0)),
                pl.BlockSpec((C_out, 1), lambda n: (0, 0)),
                pl.BlockSpec((4, M), lambda n: (0, 0)),
            ],
            out_specs=pl.BlockSpec((1, C_out, M), lambda n: (n, 0, 0)),
            scratch_shapes=[pltpu.VMEM((C_out, M), jnp.float32)],
        ),
        compiler_params=pltpu.CompilerParams(
            dimension_semantics=("parallel",),
        ),
    )(xf, wk, b2, masks)

    # Free reshape back to the PyTorch NCHW output convention.
    return out_flat.reshape(N, C_out, H, W)


if __name__ == "__main__":
    # Small shapes consistent with the module.
    N, C_in, C_out, H, W = 2, 4, 8, 16, 16

    key = jax.random.PRNGKey(0)
    kx, kwk, kb = jax.random.split(key, 3)
    x = jax.random.normal(kx, (N, C_in, H, W), dtype=jnp.float32)
    weight = jax.random.normal(kwk, (C_out, C_in, KH, KW), dtype=jnp.float32) * 0.1
    bias = jax.random.normal(kb, (C_out,), dtype=jnp.float32) * 0.1

    out = jax.block_until_ready(conv_padding_forward(x, weight, bias))

    # Reference check against XLA conv (NCHW, OIHW).
    ref = jax.lax.conv_general_dilated(
        x, weight, window_strides=(1, 1), padding=((1, 1), (1, 1)),
        dimension_numbers=("NCHW", "OIHW", "NCHW"),
    ) + bias.reshape(1, C_out, 1, 1)
    assert out.shape == (N, C_out, H, W)
    assert jnp.allclose(out, ref, atol=2e-4, rtol=2e-4)

    print("KERNEL_OK")
</pallas_src>

<mosaic_0001>
module attributes {stable_mosaic.version = 11 : i64} {
  func.func @_conv_kernel(%arg0: i32, %arg1: memref<1x4x256xf32, #tpu.memory_space<vmem>>, %arg2: memref<3x8x12xf32, #tpu.memory_space<vmem>>, %arg3: memref<8x1xf32, #tpu.memory_space<vmem>>, %arg4: memref<4x256xf32, #tpu.memory_space<vmem>>, %arg5: memref<1x8x256xf32, #tpu.memory_space<vmem>>, %arg6: memref<8x256xf32, #tpu.memory_space<vmem>>) attributes {dimension_semantics = [#tpu.dimension_semantics<parallel>], iteration_bounds = array<i64: 2>, scalar_prefetch = 0 : i64, scratch_operands = 1 : i64, tpu.core_type = #tpu.core_type<tc>, window_params = [{transform_indices = @transform_0, window_bounds = array<i64: 1, 4, 256>}, {pipeline_mode = #tpu.pipeline_mode<synchronous>, transform_indices = @transform_1, window_bounds = array<i64: 3, 8, 12>}, {pipeline_mode = #tpu.pipeline_mode<synchronous>, transform_indices = @transform_2, window_bounds = array<i64: 8, 1>}, {pipeline_mode = #tpu.pipeline_mode<synchronous>, transform_indices = @transform_3, window_bounds = array<i64: 4, 256>}, {transform_indices = @transform_4, window_bounds = array<i64: 1, 8, 256>}]} {
    %c0 = arith.constant 0 : index
    %c0_0 = arith.constant 0 : index
    %c0_1 = arith.constant 0 : index
    %0 = vector.load %arg1[%c0, %c0_0, %c0_1] : memref<1x4x256xf32, #tpu.memory_space<vmem>>, vector<1x4x256xf32>
    %1 = vector.shape_cast %0 : vector<1x4x256xf32> to vector<4x256xf32>
    %c0_2 = arith.constant 0 : index
    %c0_3 = arith.constant 0 : index
    %2 = vector.load %arg4[%c0_2, %c0_3] : memref<4x256xf32, #tpu.memory_space<vmem>>, vector<1x256xf32>
    %c1 = arith.constant 1 : index
    %c0_4 = arith.constant 0 : index
    %3 = vector.load %arg4[%c1, %c0_4] : memref<4x256xf32, #tpu.memory_space<vmem>>, vector<1x256xf32>
    %c2 = arith.constant 2 : index
    %c0_5 = arith.constant 0 : index
    %4 = vector.load %arg4[%c2, %c0_5] : memref<4x256xf32, #tpu.memory_space<vmem>>, vector<1x256xf32>
    %c3 = arith.constant 3 : index
    %c0_6 = arith.constant 0 : index
    %5 = vector.load %arg4[%c3, %c0_6] : memref<4x256xf32, #tpu.memory_space<vmem>>, vector<1x256xf32>
    %c1_i32 = arith.constant 1 : i32
    %6 = tpu.dynamic_rotate %1 by %c1_i32 dim 1 : vector<4x256xf32>, i32 -> vector<4x256xf32>
    %7 = vector.broadcast %2 : vector<1x256xf32> to vector<4x256xf32>
    %8 = arith.mulf %6, %7 : vector<4x256xf32>
    %c255_i32 = arith.constant 255 : i32
    %9 = tpu.dynamic_rotate %1 by %c255_i32 dim 1 : vector<4x256xf32>, i32 -> vector<4x256xf32>
    %10 = vector.broadcast %3 : vector<1x256xf32> to vector<4x256xf32>
    %11 = arith.mulf %9, %10 : vector<4x256xf32>
    %12 = tpu.concatenate %8, %1, %11 in 0 : vector<4x256xf32>, vector<4x256xf32>, vector<4x256xf32> -> vector<12x256xf32>
    %c0_7 = arith.constant 0 : index
    %c0_8 = arith.constant 0 : index
    %13 = vector.load %arg3[%c0_7, %c0_8] : memref<8x1xf32, #tpu.memory_space<vmem>>, vector<8x1xf32>
    %14 = vector.shape_cast %13 : vector<8x1xf32> to vector<8x1xf32>
    %15 = vector.broadcast %14 : vector<8x1xf32> to vector<8x256xf32>
    %c0_9 = arith.constant 0 : index
    %c0_10 = arith.constant 0 : index
    %16 = vector.load %arg6[%c0_9, %c0_10] : memref<8x256xf32, #tpu.memory_space<vmem>>, vector<8x256xf32>
    tpu.vector_store %arg6[%c0_9, %c0_10], %15 {strides = array<i32>} : memref<8x256xf32, #tpu.memory_space<vmem>>, vector<8x256xf32>,
    %c0_11 = arith.constant 0 : index
    %c0_12 = arith.constant 0 : index
    %17 = vector.load %arg6[%c0_11, %c0_12] : memref<8x256xf32, #tpu.memory_space<vmem>>, vector<8x256xf32>
    %c1_13 = arith.constant 1 : index
    %c0_14 = arith.constant 0 : index
    %c0_15 = arith.constant 0 : index
    %18 = vector.load %arg2[%c1_13, %c0_14, %c0_15] : memref<3x8x12xf32, #tpu.memory_space<vmem>>, vector<1x8x12xf32>
    %19 = vector.shape_cast %18 : vector<1x8x12xf32> to vector<8x12xf32>
    %cst = arith.constant dense<0.000000e+00> : vector<8x256xf32>
    %20 = tpu.matmul %19, %12, %cst {dimension_numbers = #tpu.dot_dimension_numbers<[1], [0], [0], [1], [0, 0, 1, 1], [], []>} : vector<8x12xf32>, vector<12x256xf32>, vector<8x256xf32> -> vector<8x256xf32>
    %21 = arith.addf %17, %20 : vector<8x256xf32>
    %c0_16 = arith.constant 0 : index
    %c0_17 = arith.constant 0 : index
    %22 = vector.load %arg6[%c0_16, %c0_17] : memref<8x256xf32, #tpu.memory_space<vmem>>, vector<8x256xf32>
    tpu.vector_store %arg6[%c0_16, %c0_17], %21 {strides = array<i32>} : memref<8x256xf32, #tpu.memory_space<vmem>>, vector<8x256xf32>,
    %c16_i32 = arith.constant 16 : i32
    %23 = tpu.dynamic_rotate %12 by %c16_i32 dim 1 : vector<12x256xf32>, i32 -> vector<12x256xf32>
    %c0_18 = arith.constant 0 : index
    %c0_19 = arith.constant 0 : index
    %24 = vector.load %arg6[%c0_18, %c0_19] : memref<8x256xf32, #tpu.memory_space<vmem>>, vector<8x256xf32>
    %c0_20 = arith.constant 0 : index
    %c0_21 = arith.constant 0 : index
    %c0_22 = arith.constant 0 : index
    %25 = vector.load %arg2[%c0_20, %c0_21, %c0_22] : memref<3x8x12xf32, #tpu.memory_space<vmem>>, vector<1x8x12xf32>
    %26 = vector.shape_cast %25 : vector<1x8x12xf32> to vector<8x12xf32>
    %cst_23 = arith.constant dense<0.000000e+00> : vector<8x256xf32>
    %27 = tpu.matmul %26, %23, %cst_23 {dimension_numbers = #tpu.dot_dimension_numbers<[1], [0], [0], [1], [0, 0, 1, 1], [], []>} : vector<8x12xf32>, vector<12x256xf32>, vector<8x256xf32> -> vector<8x256xf32>
    %28 = vector.broadcast %4 : vector<1x256xf32> to vector<8x256xf32>
    %29 = arith.mulf %27, %28 : vector<8x256xf32>
    %30 = arith.addf %24, %29 : vector<8x256xf32>
    %c0_24 = arith.constant 0 : index
    %c0_25 = arith.constant 0 : index
    %31 = vector.load %arg6[%c0_24, %c0_25] : memref<8x256xf32, #tpu.memory_space<vmem>>, vector<8x256xf32>
    tpu.vector_store %arg6[%c0_24, %c0_25], %30 {strides = array<i32>} : memref<8x256xf32, #tpu.memory_space<vmem>>, vector<8x256xf32>,
    %c240_i32 = arith.constant 240 : i32
    %32 = tpu.dynamic_rotate %12 by %c240_i32 dim 1 : vector<12x256xf32>, i32 -> vector<12x256xf32>
    %c0_26 = arith.constant 0 : index
    %c0_27 = arith.constant 0 : index
    %33 = vector.load %arg6[%c0_26, %c0_27] : memref<8x256xf32, #tpu.memory_space<vmem>>, vector<8x256xf32>
    %c2_28 = arith.constant 2 : index
    %c0_29 = arith.constant 0 : index
    %c0_30 = arith.constant 0 : index
    %34 = vector.load %arg2[%c2_28, %c0_29, %c0_30] : memref<3x8x12xf32, #tpu.memory_space<vmem>>, vector<1x8x12xf32>
    %35 = vector.shape_cast %34 : vector<1x8x12xf32> to vector<8x12xf32>
    %cst_31 = arith.constant dense<0.000000e+00> : vector<8x256xf32>
    %36 = tpu.matmul %35, %32, %cst_31 {dimension_numbers = #tpu.dot_dimension_numbers<[1], [0], [0], [1], [0, 0, 1, 1], [], []>} : vector<8x12xf32>, vector<12x256xf32>, vector<8x256xf32> -> vector<8x256xf32>
    %37 = vector.broadcast %5 : vector<1x256xf32> to vector<8x256xf32>
    %38 = arith.mulf %36, %37 : vector<8x256xf32>
    %39 = arith.addf %33, %38 : vector<8x256xf32>
    %c0_32 = arith.constant 0 : index
    %c0_33 = arith.constant 0 : index
    %40 = vector.load %arg6[%c0_32, %c0_33] : memref<8x256xf32, #tpu.memory_space<vmem>>, vector<8x256xf32>
    tpu.vector_store %arg6[%c0_32, %c0_33], %39 {strides = array<i32>} : memref<8x256xf32, #tpu.memory_space<vmem>>, vector<8x256xf32>,
    %c0_34 = arith.constant 0 : index
    %c0_35 = arith.constant 0 : index
    %41 = vector.load %arg6[%c0_34, %c0_35] : memref<8x256xf32, #tpu.memory_space<vmem>>, vector<8x256xf32>
    %c0_36 = arith.constant 0 : index
    %c0_37 = arith.constant 0 : index
    %c0_38 = arith.constant 0 : index
    %42 = vector.load %arg5[%c0_36, %c0_37, %c0_38] : memref<1x8x256xf32, #tpu.memory_space<vmem>>, vector<1x8x256xf32>
    %43 = vector.shape_cast %42 : vector<1x8x256xf32> to vector<8x256xf32>
    %44 = vector.shape_cast %41 : vector<8x256xf32> to vector<1x8x256xf32>
    tpu.vector_store %arg5[%c0_36, %c0_37, %c0_38], %44 {strides = array<i32>} : memref<1x8x256xf32, #tpu.memory_space<vmem>>, vector<1x8x256xf32>,
    return
  }
  func.func @transform_0(%arg0: i32) -> (i32, i32, i32) {
    %c0_i32 = arith.constant 0 : i32
    %c0_i32_0 = arith.constant 0 : i32
    %c0_i32_1 = arith.constant 0 : i32
    return %arg0, %c0_i32, %c0_i32_0 : i32, i32, i32
  }
  func.func @transform_1(%arg0: i32) -> (i32, i32, i32) {
    %c0_i32 = arith.constant 0 : i32
    %c0_i32_0 = arith.constant 0 : i32
    %c0_i32_1 = arith.constant 0 : i32
    %c0_i32_2 = arith.constant 0 : i32
    return %c0_i32, %c0_i32_0, %c0_i32_1 : i32, i32, i32
  }
  func.func @transform_2(%arg0: i32) -> (i32, i32) {
    %c0_i32 = arith.constant 0 : i32
    %c0_i32_0 = arith.constant 0 : i32
    %c0_i32_1 = arith.constant 0 : i32
    return %c0_i32, %c0_i32_0 : i32, i32
  }
  func.func @transform_3(%arg0: i32) -> (i32, i32) {
    %c0_i32 = arith.constant 0 : i32
    %c0_i32_0 = arith.constant 0 : i32
    %c0_i32_1 = arith.constant 0 : i32
    return %c0_i32, %c0_i32_0 : i32, i32
  }
  func.func @transform_4(%arg0: i32) -> (i32, i32, i32) {
    %c0_i32 = arith.constant 0 : i32
    %c0_i32_0 = arith.constant 0 : i32
    %c0_i32_1 = arith.constant 0 : i32
    return %arg0, %c0_i32, %c0_i32_0 : i32, i32, i32
  }
}

</mosaic_0001>

<bundles_post_ra>
// kernel: conv_padding_forward.1
= control target key start
LH: loop header
LB: loop body
LE: loop exit
PB: predicated region body
PF: predicated region fallthrough
CT: control target
= control target key end

     0   :  { %s762_s15 = smov 0   ;;  %s847_s0 = inlined_call_operand.vmem [shape: f32[2,4,256], index: 0, kind: input, shape index: {}]   ;;  %s848_s1 = inlined_call_operand.vmem [shape: f32[3,8,12], index: 1, kind: input, shape index: {}]   ;;  %s849_s2 = inlined_call_operand.vmem [shape: f32[8,1], index: 2, kind: input, shape index: {}]   ;;  %s850_s3 = inlined_call_operand.vmem [shape: f32[4,256], index: 3, kind: input, shape index: {}]   ;;  %s851_s4 = inlined_call_operand.vmem [shape: f32[2,8,256], index: 4, kind: output, shape index: {}]  }
   0x1 LB: > { %s639_s16 = sadd.s32 4294967295, %s728_s15   ;;  %p643_p0 = scmp.ge.s32.totalorder %s728_s15, 1  ;;  %s728_s15 = sphi %s762_s15, %s14_s15  }
   0x2   : > { %p162_p1 = scmp.lt.s32.totalorder %s728_s15, 3 }
   0x4   : > { %p163_p2 = pnand %p643_p0, %p162_p1 }
   0x5   : > { %p188_p3 = scmp.lt.s32.totalorder (!%p163_p2), %s639_s16, 1  ;;  %s730_s21 = smov (!%p163_p2), 127   ;;  %v213_v2 = vlaneseq (!%p163_p2)  ;;  %v648_v7 = vld [vmem:[%s850_s3 + $0x1] ss:$4 sm:$0x3] (!%p163_p2)  ;;  %vm253_vm2 = vcmask (!%p163_p2), 1043456  }
   0x6   : > { %166 = sbr.rel (%p163_p2) target bundleno = 488 (0x1e8), region = 36  ;;  %s731_s22 = smov (!%p163_p2), 1   ;;  %v199_v8 = vld [vmem:[%s850_s3] ss:$4 sm:$0x3] (!%p163_p2)  ;;  %v732_v28 = vmov (!%p163_p2), 0.0  }
   0x7   : > { %v220_v3 = vshrl.u32 (!%p163_p2), %v213_v2, 7  ;;  %v776_v4 = vand.u32 (!%p163_p2), 127, %v213_v2  ;;  %342 = vmatprep.mubr.f32.mxu0 (!%p163_p2), %v732_v28  ;;  %442 = vmatprep.mubr.f32.mxu1 (!%p163_p2), %v732_v28  ;;  %vm733_vm3 = vmmov (!%p163_p2), 1   ;;  %s734_s27 = smov (!%p163_p2), 16   ;;  %v735_v34 = vmov (!%p163_p2), 0   ;;  %v651_v35 = vld [vmem:[%s848_s1 + $0x8] sm:$0xff] (!%p163_p2) }
   0x8   : > { %vm797_vm4 = vmpackc.low (!%p163_p2), %vm253_vm2, %vm733_vm3  ;;  %719 = vset.pattern.permute.xlu0 (!%p163_p2), %v735_v34  ;;  %vm268_vm5 = vcmask (!%p163_p2), 97280   ;;  %s736_s30 = smov (!%p163_p2), 112   ;;  %v256_v36 = vld [vmem:[%s849_s2] sm:$0xff] (!%p163_p2)  ;;  %v658_v62 = vld [vmem:[%s848_s1 + $0x10] sm:$0xff] (!%p163_p2) }
   0x9   : > { %v778_v5 = vsub.s32 (!%p163_p2), 0, %v220_v3  ;;  %v780_v6 = vsub.s32 (!%p163_p2), 1, %v220_v3  ;;  %vm235_vm0 = vcmp.lt.s32.totalorder (!%p163_p2), %v776_v4, 127  ;;  %vm215_vm1 = vcmp.lt.s32.totalorder (!%p163_p2), %v776_v4, 1  ;;  %v368_v59 = vld [vmem:[%s848_s1] sm:$0xff] (!%p163_p2) }
   0xa   : > { %vm361_vm6 = vcmp.lt.s32.totalorder (!%p163_p2), %v776_v4, 16  ;;  %vm474_vm7 = vcmp.lt.s32.totalorder (!%p163_p2), %v776_v4, 112 }
   0xb   : > { %v242_v11 = vrot.slane (!%p163_p2), %v648_v7, %v778_v5  ;;  %v246_v12 = vrot.slane (!%p163_p2), %v648_v7, %v780_v6  ;;  %v222_v13 = vrot.slane (!%p163_p2), %v199_v8, %v778_v5  ;;  %v226_v14 = vrot.slane (!%p163_p2), %v199_v8, %v780_v6  ;;  %v650_v7 = vld [vmem:[%s850_s3 + $0x3] ss:$4 sm:$0x3] (!%p163_p2) }
   0xd   : > { %s855_s16 = smov (!%p188_p3, %s639_s16), 1 }
   0xe   : > { %s664_s17 = sshll.u32 %s855_s16, 3 }
   0xf   : > { %s192_s20 = scalar_lea.vmem %s847_s0, %s664_s17  ;;  %s665_s17 = sshll.u32 %s855_s16, 4 }
  0x10   : > { %v198_v0 = vld [vmem:[%s192_s20] sm:$0xff]  ;;  %s197_s20 = scalar_lea.vmem %s851_s4, %s665_s17 }
  0x11   : > { %231 = vrot.lane.b32.xlu1 %v198_v0, %s730_s21  ;;  %209 = vrot.lane.b32.xlu0 %v198_v0, %s731_s22  ;;  %v207_v1 = vcombine.high %v198_v0, %v198_v0  ;;  %v251_v17 = vcombine.low %v198_v0, %v198_v0 }
  0x15   : > { %233 = vrot.lane.b32.xlu1 %v207_v1, %s730_s21  ;;  %211 = vrot.lane.b32.xlu0 %v207_v1, %s731_s22  ;;  %v649_v1 = vld [vmem:[%s850_s3 + $0x2] ss:$4 sm:$0x3] }
  0x16   : > { %v453_v3 = vrot.slane %v649_v1, %v778_v5  ;;  %v457_v4 = vrot.slane %v649_v1, %v780_v6 }
  0x83   : > { %v232_v9 = vpop.permute.xlu1 %231  ;;  %v210_v10 = vpop.permute.xlu0 %209 }
  0x87   : > { %v234_v15 = vpop.permute.xlu1 %233  ;;  %v212_v16 = vpop.permute.xlu0 %211 }
  0x88   : > { %v236_v18 = vsel %vm235_vm0, %v232_v9, %v234_v15  ;;  %v237_v19 = vsel %vm235_vm0, %v234_v15, %v232_v9  ;;  %v216_v20 = vsel %vm215_vm1, %v210_v10, %v212_v16  ;;  %v217_v21 = vsel %vm215_vm1, %v212_v16, %v210_v10 }
  0x89   : > { %v249_v22 = vmul.f32 %v242_v11, %v236_v18  ;;  %v250_v23 = vmul.f32 %v246_v12, %v237_v19  ;;  %v229_v24 = vmul.f32 %v222_v13, %v217_v21  ;;  %v230_v25 = vmul.f32 %v226_v14, %v216_v20 }
  0x8a   : > { %v567_v13 = vrot.slane %v650_v7, %v778_v5  ;;  %v571_v15 = vrot.slane %v650_v7, %v780_v6 }
  0x8b   : > { %v254_v26 = vsel %vm253_vm2, %v229_v24, %v251_v17  ;;  %v255_v27 = vsel %vm253_vm2, %v230_v25, %v198_v0 }
  0x8c   : > { %v699_v29 = vpack.i.bf16 %v249_v22, %v254_v26  ;;  %v704_v30 = vpack.i.bf16 %v250_v23, %v255_v27  ;;  %v666_v31 = vpack.c.bf16 %v250_v23, %v255_v27  ;;  %v669_v33 = vpack.c.bf16 %v249_v22, %v254_v26 }
  0x8e   : > { %700 = vrot.lane.b32.xlu0 %v699_v29, %s734_s27  ;;  %705 = vrot.lane.b32.xlu1 %v704_v30, %s734_s27 }
  0x8f   : > { %668 = vmatprep.subr.msk.bf16.mxu0 %vm797_vm4, %v666_v31 }
  0x90   : > { %671 = vmatpush1.bf16.msk.msra.mxu0 %vm797_vm4, %v669_v33 }
  0x92   : > { %710 = vrot.lane.b32.xlu0 %v699_v29, %s736_s30  ;;  %715 = vrot.lane.b32.xlu1 %v704_v30, %s736_s30 }
  0x93   : > { %654 = vmatmul.mubr.msk.f32.vlgmr.msra.gmra.mrb[0].mxu0 %vm268_vm5, %v651_v35 }
  0x94   : > { %556 = vmatprep.mubr.f32.mxu0 %v732_v28 }
  0x96   : > { %259 = vperm.xlu0 %719, %v256_v36  }
 0x100   : > { %v701_v37 = vpop.permute.xlu0 %700  ;;  %v706_v38 = vpop.permute.xlu1 %705 }
 0x101   : > { %v703_v39 = vunpack.i.h.bf16 %v701_v37  ;;  %v702_v40 = vunpack.i.l.bf16 %v701_v37  ;;  %v708_v41 = vunpack.i.h.bf16 %v706_v38  ;;  %v707_v42 = vunpack.i.l.bf16 %v706_v38 }
 0x103   : > { %v362_v43 = vsel %vm361_vm6, %v702_v40, %v707_v42  ;;  %v363_v44 = vsel %vm361_vm6, %v703_v39, %v708_v41  ;;  %v364_v45 = vsel %vm361_vm6, %v707_v42, %v702_v40  ;;  %v365_v46 = vsel %vm361_vm6, %v708_v41, %v703_v39 }
 0x104   : > { %v711_v47 = vpop.permute.xlu0 %710  ;;  %v716_v48 = vpop.permute.xlu1 %715  ;;  %v672_v49 = vpack.c.bf16 %v363_v44, %v362_v43  ;;  %v675_v50 = vpack.c.bf16 %v365_v46, %v364_v45 }
 0x105   : > { %v713_v51 = vunpack.i.h.bf16 %v711_v47  ;;  %v712_v52 = vunpack.i.l.bf16 %v711_v47  ;;  %v718_v53 = vunpack.i.h.bf16 %v716_v48  ;;  %v717_v54 = vunpack.i.l.bf16 %v716_v48 }
 0x106   : > { %674 = vmatprep.subr.msk.bf16.mxu1 %vm797_vm4, %v672_v49 }
 0x107   : > { %v476_v55 = vsel %vm474_vm7, %v713_v51, %v718_v53  ;;  %v478_v56 = vsel %vm474_vm7, %v718_v53, %v713_v51  ;;  %v475_v57 = vsel %vm474_vm7, %v712_v52, %v717_v54  ;;  %v477_v58 = vsel %vm474_vm7, %v717_v54, %v712_v52  ;;  %677 = vmatpush1.bf16.msk.msra.mxu1 %vm797_vm4, %v675_v50 }
 0x108   : > { %v678_v60 = vpack.c.bf16 %v478_v56, %v477_v58  ;;  %v681_v61 = vpack.c.bf16 %v476_v55, %v475_v57 }
 0x10a   : > { %657 = vmatmul.mubr.msk.f32.vlgmr.msra.gmra.mrb[0].mxu1 %vm268_vm5, %v368_v59  ;;  %680 = vmatprep.subr.msk.bf16.mxu0 %vm797_vm4, %v678_v60 }
 0x10b   : > { %683 = vmatpush1.bf16.msk.msra.mxu0 %vm797_vm4, %v681_v61 }
 0x10e   : > { %661 = vmatmul.mubr.msk.f32.vlgmr.msra.gmra.mrb[2].mxu0 %vm268_vm5, %v658_v62 }
 0x115   : > { %v260_v2 = vpop.permute.xlu0 %259 }
 0x166   : > { %v344_v63 = vpop.f32.mrb[0].mxu0 }
 0x167   : > { %v346_v0 = vpop.f32.mrb[1].mxu0  ;;  %v349_v8 = vadd.f32 %v344_v63, %v260_v2 }
 0x168   : > { %v350_v10 = vadd.f32 %v346_v0, %v260_v2 }
 0x1dd   : > { %v444_v9 = vpop.f32.mrb[0].mxu1 }
 0x1de   : > { %v460_v11 = vmul.f32 %v453_v3, %v444_v9  ;;  %v446_v12 = vpop.f32.mrb[1].mxu1 }
 0x1df   : > { %v461_v14 = vmul.f32 %v457_v4, %v446_v12 }
 0x1e0   : > { %v462_v16 = vadd.f32 %v460_v11, %v349_v8 }
 0x1e1   : > { %v463_v17 = vadd.f32 %v461_v14, %v350_v10  ;;  %v558_v18 = vpop.f32.mrb[2].mxu0 }
 0x1e2   : > { %v574_v19 = vmul.f32 %v567_v13, %v558_v18  ;;  %v560_v20 = vpop.f32.mrb[3].mxu0 }
 0x1e3   : > { %v575_v21 = vmul.f32 %v571_v15, %v560_v20 }
 0x1e4   : > { %v576_v22 = vadd.f32 %v574_v19, %v462_v16 }
 0x1e5   : > { %v577_v23 = vadd.f32 %v575_v21, %v463_v17 }
 0x1e6   : > { %582 = vst [vmem:[%s197_s20] sm:$0xff] %v576_v22 }
 0x1e7   : > { %583 = vst [vmem:[%s197_s20 + $0x8] sm:$0xff] %v577_v23 }
 0x1e8 PF: > { %s14_s15 = sadd.s32 1, %s728_s15  }
 0x1e9   : > { %p11_p4 = scmp.ge.s32.totalorder %s14_s15, 4  }
 0x1eb   :  { %13 = sbr.rel (!%p11_p4) target bundleno = 1 (0x1), region = 71 }

</bundles_post_ra>
